<compile_context>
chip_gen: v7x
topology: tpu7x:2x2x1
jax: 0.10.0
libtpu: 0.0.40
codegen_flags: <defaults>
</compile_context>

<pallas_src>
import functools
import math

import jax
import jax.numpy as jnp
from jax import lax
from jax.experimental import pallas as pl
from jax.experimental.pallas import tpu as pltpu

_DIMS = (512, 256, 128, 64, 32, 1)


def _leaky_relu(v, negative_slope=0.2):
    return jnp.where(v > 0, v, negative_slope * v)


def discriminator_kernel(x_ref,
                         w1_ref, b1_ref,
                         w2_ref, b2_ref,
                         w3_ref, b3_ref,
                         w4_ref, b4_ref,
                         w5_ref, b5_ref,
                         o_ref):
    """One batch tile.

    x_ref: (TILE_B, 512) — batch on sublanes, features on lanes (native layout).
    w{1..4}_ref: (in, out) weights in the compute dtype (f32 or bf16).
    b{1..4}_ref: (1, out) f32 bias rows.  w5_ref: (1, 32) f32.  b5_ref: (1,) f32 in SMEM.
    Each layer: h <- leaky_relu(h @ W + b), MXU with f32 accumulation.
    """
    cdt = w1_ref.dtype  # MXU operand dtype (f32 or bf16); cast happens in VMEM (free VPU slack)

    h = x_ref[...]
    h = jnp.dot(h.astype(cdt), w1_ref[...], preferred_element_type=jnp.float32)   # (TB, 256)
    h = _leaky_relu(h + b1_ref[...])
    h = jnp.dot(h.astype(cdt), w2_ref[...], preferred_element_type=jnp.float32)   # (TB, 128)
    h = _leaky_relu(h + b2_ref[...])
    h = jnp.dot(h.astype(cdt), w3_ref[...], preferred_element_type=jnp.float32)   # (TB, 64)
    h = _leaky_relu(h + b3_ref[...])
    h = jnp.dot(h.astype(cdt), w4_ref[...], preferred_element_type=jnp.float32)   # (TB, 32)
    h = _leaky_relu(h + b4_ref[...])

    # Final 32 -> 1 layer on the VPU/XLU (multiply by the (1, 32) weight row and
    # reduce across lanes) — avoids an N=1 MXU push/drain on the dependent chain.
    logits = jnp.sum(h * w5_ref[...], axis=-1, keepdims=True) + b5_ref[0]          # (TB, 1)
    o_ref[...] = logits.astype(o_ref.dtype)


def _round_up(v, m):
    return ((v + m - 1) // m) * m


def _choose_tile_b(batch, cap=2048):
    """Pick the batch-tile size.

    * Tiny batches: one full-extent tile (block dim == array dim is always legal).
    * Small batches: one tile rounded up to a multiple of 8 (sublane constraint).
    * Larger batches: aim for an (approximately even) number of >= 2 tiles so the
      "parallel" grid axis shards across both v7x TensorCores, capped at `cap`
      rows so the double-buffered f32 input tile stays a few MiB.
    """
    if batch <= 8:
        return batch
    if batch <= 128:
        return _round_up(batch, 8)
    pairs = 1
    tile = _round_up(pl.cdiv(batch, 2 * pairs), 128)
    while tile > cap:
        pairs += 1
        tile = _round_up(pl.cdiv(batch, 2 * pairs), 128)
    return tile


@functools.partial(jax.jit, static_argnames=("weight_dtype", "tile_b"))
def discriminator_forward(x, params, weight_dtype=jnp.float32, tile_b=None):
    """x: (B, 512). params: PyTorch-layout w{i}:(out,in), b{i}:(out,). Returns (B, 1) f32."""
    batch, in_dim = x.shape
    assert in_dim == _DIMS[0]
    if tile_b is None:
        tile_b = _choose_tile_b(batch)
    n_tiles = pl.cdiv(batch, tile_b)
    # No wrapper-side transpose/pad: a ragged last tile reads past the end of x,
    # which is safe because every output row depends only on its own input row
    # and out-of-range output rows are masked on writeback.

    args = [x]
    in_specs = [pl.BlockSpec((tile_b, in_dim), lambda i: (i, 0))]
    # TODO(synk): if an xprof trace shows gaps between input DMAs on v7x, add
    # pipeline_mode=pl.Buffered(3) to the x BlockSpec above.

    for layer in range(1, 5):
        # Tiny weights: pre-transpose to (in, out) and (optionally) pre-cast to
        # bf16 in the wrapper — one-time 0.67 MB, negligible vs x traffic.
        w = params[f"w{layer}"].T.astype(weight_dtype)            # (in, out)
        b = params[f"b{layer}"].astype(jnp.float32).reshape(1, -1)  # (1, out)
        args += [w, b]
        # Full-array blocks with constant index_map: DMA'd once, stay VMEM-resident.
        in_specs += [pl.BlockSpec(w.shape, lambda i: (0, 0)),
                     pl.BlockSpec(b.shape, lambda i: (0, 0))]

    # Final layer runs on the VPU: (1, 32) f32 weight row + scalar bias in SMEM.
    w5 = params["w5"].astype(jnp.float32)                          # (1, 32)
    b5 = params["b5"].astype(jnp.float32).reshape(1)               # (1,)
    args += [w5, b5]
    in_specs += [pl.BlockSpec(w5.shape, lambda i: (0, 0)),
                 pl.BlockSpec(memory_space=pltpu.MemorySpace.SMEM)]

    out_specs = pl.BlockSpec((tile_b, 1), lambda i: (i, 0))
    out_shape = jax.ShapeDtypeStruct((batch, 1), jnp.float32)

    flops = 2 * batch * sum(_DIMS[k] * _DIMS[k + 1] for k in range(5))
    bytes_accessed = (int(x.size) * x.dtype.itemsize
                      + sum(int(a.size) * a.dtype.itemsize for a in args[1:])
                      + batch * 4)

    out = pl.pallas_call(
        discriminator_kernel,
        out_shape=out_shape,
        grid_spec=pltpu.PrefetchScalarGridSpec(
            num_scalar_prefetch=0,
            grid=(n_tiles,),
            in_specs=in_specs,
            out_specs=out_specs,
        ),
        compiler_params=pltpu.CompilerParams(
            dimension_semantics=("parallel",),       # shard batch tiles across TCs (v7x)
            vmem_limit_bytes=48 * 1024 * 1024,       # headroom for 2048-row f32 tiles
        ),
        cost_estimate=pl.CostEstimate(
            flops=flops, transcendentals=0, bytes_accessed=bytes_accessed),
    )(*args)

    return out


def init_params(key):
    """Deterministic init mirroring nn.Linear; weights stored (out_features, in_features)."""
    params = {}
    keys = jax.random.split(key, 2 * (len(_DIMS) - 1))
    for i in range(len(_DIMS) - 1):
        fan_in, fan_out = _DIMS[i], _DIMS[i + 1]
        bound = 1.0 / math.sqrt(fan_in)
        params[f"w{i + 1}"] = jax.random.uniform(
            keys[2 * i], (fan_out, fan_in), minval=-bound, maxval=bound,
            dtype=jnp.float32)
        params[f"b{i + 1}"] = jax.random.uniform(
            keys[2 * i + 1], (fan_out,), minval=-bound, maxval=bound,
            dtype=jnp.float32)
    return params


def reference_forward(x, params):
    h = x
    for i in range(1, 5):
        h = jnp.dot(h, params[f"w{i}"].T,
                    precision=lax.Precision.HIGHEST) + params[f"b{i}"]
        h = jnp.where(h > 0, h, 0.2 * h)
    return jnp.dot(h, params["w5"].T,
                   precision=lax.Precision.HIGHEST) + params["b5"]


if __name__ == "__main__":
    key = jax.random.PRNGKey(0)
    pkey, xkey, xkey2 = jax.random.split(key, 3)
    params = init_params(pkey)

    # Small demo batch: a single 8-row tile.
    B = 8
    x = jax.random.normal(xkey, (B, 512), dtype=jnp.float32)
    ref = reference_forward(x, params)
    out_f32 = jax.block_until_ready(discriminator_forward(x, params))
    assert out_f32.shape == (B, 1)
    assert jnp.allclose(out_f32, ref, atol=1e-2, rtol=1e-2), "f32 kernel mismatch"

    # Multi-tile case with a ragged last tile (2 tiles of 128 rows, 200 valid).
    B2 = 200
    x2 = jax.random.normal(xkey2, (B2, 512), dtype=jnp.float32)
    ref2 = reference_forward(x2, params)
    out2 = jax.block_until_ready(discriminator_forward(x2, params))
    assert out2.shape == (B2, 1)
    assert jnp.allclose(out2, ref2, atol=1e-2, rtol=1e-2), "ragged-tile kernel mismatch"

    # bf16 weights (full-rate MXU on v6e/v7x); x stays f32, cast in-kernel; f32 accumulation.
    out_bf16 = jax.block_until_ready(
        discriminator_forward(x, params, weight_dtype=jnp.bfloat16))
    assert out_bf16.shape == (B, 1)
    assert jnp.allclose(out_bf16, ref, atol=1e-1, rtol=1e-1), "bf16 kernel mismatch"

    print("KERNEL_OK")
</pallas_src>

<mosaic_0001>
module attributes {stable_mosaic.version = 11 : i64} {
  func.func @discriminator_kernel(%arg0: i32, %arg1: memref<8x512xf32, #tpu.memory_space<vmem>>, %arg2: memref<512x256xf32, #tpu.memory_space<vmem>>, %arg3: memref<1x256xf32, #tpu.memory_space<vmem>>, %arg4: memref<256x128xf32, #tpu.memory_space<vmem>>, %arg5: memref<1x128xf32, #tpu.memory_space<vmem>>, %arg6: memref<128x64xf32, #tpu.memory_space<vmem>>, %arg7: memref<1x64xf32, #tpu.memory_space<vmem>>, %arg8: memref<64x32xf32, #tpu.memory_space<vmem>>, %arg9: memref<1x32xf32, #tpu.memory_space<vmem>>, %arg10: memref<1x32xf32, #tpu.memory_space<vmem>>, %arg11: memref<1xf32, #tpu.memory_space<smem>>, %arg12: memref<8x1xf32, #tpu.memory_space<vmem>>) attributes {dimension_semantics = [#tpu.dimension_semantics<parallel>], iteration_bounds = array<i64: 1>, scalar_prefetch = 0 : i64, scratch_operands = 0 : i64, tpu.core_type = #tpu.core_type<tc>, window_params = [{transform_indices = @transform_0, window_bounds = array<i64: 8, 512>}, {pipeline_mode = #tpu.pipeline_mode<synchronous>, transform_indices = @transform_1, window_bounds = array<i64: 512, 256>}, {pipeline_mode = #tpu.pipeline_mode<synchronous>, transform_indices = @transform_2, window_bounds = array<i64: 1, 256>}, {pipeline_mode = #tpu.pipeline_mode<synchronous>, transform_indices = @transform_3, window_bounds = array<i64: 256, 128>}, {pipeline_mode = #tpu.pipeline_mode<synchronous>, transform_indices = @transform_4, window_bounds = array<i64: 1, 128>}, {pipeline_mode = #tpu.pipeline_mode<synchronous>, transform_indices = @transform_5, window_bounds = array<i64: 128, 64>}, {pipeline_mode = #tpu.pipeline_mode<synchronous>, transform_indices = @transform_6, window_bounds = array<i64: 1, 64>}, {pipeline_mode = #tpu.pipeline_mode<synchronous>, transform_indices = @transform_7, window_bounds = array<i64: 64, 32>}, {pipeline_mode = #tpu.pipeline_mode<synchronous>, transform_indices = @transform_8, window_bounds = array<i64: 1, 32>}, {pipeline_mode = #tpu.pipeline_mode<synchronous>, transform_indices = @transform_9, window_bounds = array<i64: 1, 32>}, {transform_indices = @transform_10, window_bounds = array<i64: 1>}, {transform_indices = @transform_11, window_bounds = array<i64: 8, 1>}]} {
    %c0 = arith.constant 0 : index
    %c0_0 = arith.constant 0 : index
    %0 = vector.load %arg1[%c0, %c0_0] : memref<8x512xf32, #tpu.memory_space<vmem>>, vector<8x512xf32>
    %c0_1 = arith.constant 0 : index
    %c0_2 = arith.constant 0 : index
    %1 = vector.load %arg2[%c0_1, %c0_2] : memref<512x256xf32, #tpu.memory_space<vmem>>, vector<512x256xf32>
    %cst = arith.constant dense<0.000000e+00> : vector<8x256xf32>
    %2 = tpu.matmul %0, %1, %cst {dimension_numbers = #tpu.dot_dimension_numbers<[1], [0], [0], [1], [0, 0, 1, 1], [], []>} : vector<8x512xf32>, vector<512x256xf32>, vector<8x256xf32> -> vector<8x256xf32>
    %c0_3 = arith.constant 0 : index
    %c0_4 = arith.constant 0 : index
    %3 = vector.load %arg3[%c0_3, %c0_4] : memref<1x256xf32, #tpu.memory_space<vmem>>, vector<1x256xf32>
    %4 = vector.broadcast %3 : vector<1x256xf32> to vector<8x256xf32>
    %5 = arith.addf %2, %4 : vector<8x256xf32>
    %cst_5 = arith.constant 0.000000e+00 : f32
    %6 = vector.broadcast %cst_5 : f32 to vector<8x256xf32>
    %7 = arith.cmpf ogt, %5, %6 : vector<8x256xf32>
    %cst_6 = arith.constant 2.000000e-01 : f32
    %8 = vector.broadcast %cst_6 : f32 to vector<8x256xf32>
    %9 = arith.mulf %8, %5 : vector<8x256xf32>
    %10 = arith.select %7, %5, %9 : vector<8x256xi1>, vector<8x256xf32>
    %c0_7 = arith.constant 0 : index
    %c0_8 = arith.constant 0 : index
    %11 = vector.load %arg4[%c0_7, %c0_8] : memref<256x128xf32, #tpu.memory_space<vmem>>, vector<256x128xf32>
    %cst_9 = arith.constant dense<0.000000e+00> : vector<8x128xf32>
    %12 = tpu.matmul %10, %11, %cst_9 {dimension_numbers = #tpu.dot_dimension_numbers<[1], [0], [0], [1], [0, 0, 1, 1], [], []>} : vector<8x256xf32>, vector<256x128xf32>, vector<8x128xf32> -> vector<8x128xf32>
    %c0_10 = arith.constant 0 : index
    %c0_11 = arith.constant 0 : index
    %13 = vector.load %arg5[%c0_10, %c0_11] : memref<1x128xf32, #tpu.memory_space<vmem>>, vector<1x128xf32>
    %14 = vector.broadcast %13 : vector<1x128xf32> to vector<8x128xf32>
    %15 = arith.addf %12, %14 : vector<8x128xf32>
    %cst_12 = arith.constant 0.000000e+00 : f32
    %16 = vector.broadcast %cst_12 : f32 to vector<8x128xf32>
    %17 = arith.cmpf ogt, %15, %16 : vector<8x128xf32>
    %cst_13 = arith.constant 2.000000e-01 : f32
    %18 = vector.broadcast %cst_13 : f32 to vector<8x128xf32>
    %19 = arith.mulf %18, %15 : vector<8x128xf32>
    %20 = arith.select %17, %15, %19 : vector<8x128xi1>, vector<8x128xf32>
    %c0_14 = arith.constant 0 : index
    %c0_15 = arith.constant 0 : index
    %21 = vector.load %arg6[%c0_14, %c0_15] : memref<128x64xf32, #tpu.memory_space<vmem>>, vector<128x64xf32>
    %cst_16 = arith.constant dense<0.000000e+00> : vector<8x64xf32>
    %22 = tpu.matmul %20, %21, %cst_16 {dimension_numbers = #tpu.dot_dimension_numbers<[1], [0], [0], [1], [0, 0, 1, 1], [], []>} : vector<8x128xf32>, vector<128x64xf32>, vector<8x64xf32> -> vector<8x64xf32>
    %c0_17 = arith.constant 0 : index
    %c0_18 = arith.constant 0 : index
    %23 = vector.load %arg7[%c0_17, %c0_18] : memref<1x64xf32, #tpu.memory_space<vmem>>, vector<1x64xf32>
    %24 = vector.broadcast %23 : vector<1x64xf32> to vector<8x64xf32>
    %25 = arith.addf %22, %24 : vector<8x64xf32>
    %cst_19 = arith.constant 0.000000e+00 : f32
    %26 = vector.broadcast %cst_19 : f32 to vector<8x64xf32>
    %27 = arith.cmpf ogt, %25, %26 : vector<8x64xf32>
    %cst_20 = arith.constant 2.000000e-01 : f32
    %28 = vector.broadcast %cst_20 : f32 to vector<8x64xf32>
    %29 = arith.mulf %28, %25 : vector<8x64xf32>
    %30 = arith.select %27, %25, %29 : vector<8x64xi1>, vector<8x64xf32>
    %c0_21 = arith.constant 0 : index
    %c0_22 = arith.constant 0 : index
    %31 = vector.load %arg8[%c0_21, %c0_22] : memref<64x32xf32, #tpu.memory_space<vmem>>, vector<64x32xf32>
    %cst_23 = arith.constant dense<0.000000e+00> : vector<8x32xf32>
    %32 = tpu.matmul %30, %31, %cst_23 {dimension_numbers = #tpu.dot_dimension_numbers<[1], [0], [0], [1], [0, 0, 1, 1], [], []>} : vector<8x64xf32>, vector<64x32xf32>, vector<8x32xf32> -> vector<8x32xf32>
    %c0_24 = arith.constant 0 : index
    %c0_25 = arith.constant 0 : index
    %33 = vector.load %arg9[%c0_24, %c0_25] : memref<1x32xf32, #tpu.memory_space<vmem>>, vector<1x32xf32>
    %34 = vector.broadcast %33 : vector<1x32xf32> to vector<8x32xf32>
    %35 = arith.addf %32, %34 : vector<8x32xf32>
    %cst_26 = arith.constant 0.000000e+00 : f32
    %36 = vector.broadcast %cst_26 : f32 to vector<8x32xf32>
    %37 = arith.cmpf ogt, %35, %36 : vector<8x32xf32>
    %cst_27 = arith.constant 2.000000e-01 : f32
    %38 = vector.broadcast %cst_27 : f32 to vector<8x32xf32>
    %39 = arith.mulf %38, %35 : vector<8x32xf32>
    %40 = arith.select %37, %35, %39 : vector<8x32xi1>, vector<8x32xf32>
    %c0_28 = arith.constant 0 : index
    %c0_29 = arith.constant 0 : index
    %41 = vector.load %arg10[%c0_28, %c0_29] : memref<1x32xf32, #tpu.memory_space<vmem>>, vector<1x32xf32>
    %42 = vector.broadcast %41 : vector<1x32xf32> to vector<8x32xf32>
    %43 = arith.mulf %40, %42 : vector<8x32xf32>
    %cst_30 = arith.constant dense<0.000000e+00> : vector<8xf32>
    %44 = vector.multi_reduction <add>, %43, %cst_30 [1] : vector<8x32xf32> to vector<8xf32>
    %45 = vector.shape_cast %44 : vector<8xf32> to vector<8x1xf32>
    %c0_31 = arith.constant 0 : index
    %46 = memref.load %arg11[%c0_31] : memref<1xf32, #tpu.memory_space<smem>>
    %47 = vector.broadcast %46 : f32 to vector<8x1xf32>
    %48 = arith.addf %45, %47 : vector<8x1xf32>
    %c0_32 = arith.constant 0 : index
    %c0_33 = arith.constant 0 : index
    %49 = vector.load %arg12[%c0_32, %c0_33] : memref<8x1xf32, #tpu.memory_space<vmem>>, vector<8x1xf32>
    tpu.vector_store %arg12[%c0_32, %c0_33], %48 {strides = array<i32>} : memref<8x1xf32, #tpu.memory_space<vmem>>, vector<8x1xf32>,
    return
  }
  func.func @transform_0(%arg0: i32) -> (i32, i32) {
    %c0_i32 = arith.constant 0 : i32
    %c0_i32_0 = arith.constant 0 : i32
    return %arg0, %c0_i32 : i32, i32
  }
  func.func @transform_1(%arg0: i32) -> (i32, i32) {
    %c0_i32 = arith.constant 0 : i32
    %c0_i32_0 = arith.constant 0 : i32
    %c0_i32_1 = arith.constant 0 : i32
    return %c0_i32, %c0_i32_0 : i32, i32
  }
  func.func @transform_2(%arg0: i32) -> (i32, i32) {
    %c0_i32 = arith.constant 0 : i32
    %c0_i32_0 = arith.constant 0 : i32
    %c0_i32_1 = arith.constant 0 : i32
    return %c0_i32, %c0_i32_0 : i32, i32
  }
  func.func @transform_3(%arg0: i32) -> (i32, i32) {
    %c0_i32 = arith.constant 0 : i32
    %c0_i32_0 = arith.constant 0 : i32
    %c0_i32_1 = arith.constant 0 : i32
    return %c0_i32, %c0_i32_0 : i32, i32
  }
  func.func @transform_4(%arg0: i32) -> (i32, i32) {
    %c0_i32 = arith.constant 0 : i32
    %c0_i32_0 = arith.constant 0 : i32
    %c0_i32_1 = arith.constant 0 : i32
    return %c0_i32, %c0_i32_0 : i32, i32
  }
  func.func @transform_5(%arg0: i32) -> (i32, i32) {
    %c0_i32 = arith.constant 0 : i32
    %c0_i32_0 = arith.constant 0 : i32
    %c0_i32_1 = arith.constant 0 : i32
    return %c0_i32, %c0_i32_0 : i32, i32
  }
  func.func @transform_6(%arg0: i32) -> (i32, i32) {
    %c0_i32 = arith.constant 0 : i32
    %c0_i32_0 = arith.constant 0 : i32
    %c0_i32_1 = arith.constant 0 : i32
    return %c0_i32, %c0_i32_0 : i32, i32
  }
  func.func @transform_7(%arg0: i32) -> (i32, i32) {
    %c0_i32 = arith.constant 0 : i32
    %c0_i32_0 = arith.constant 0 : i32
    %c0_i32_1 = arith.constant 0 : i32
    return %c0_i32, %c0_i32_0 : i32, i32
  }
  func.func @transform_8(%arg0: i32) -> (i32, i32) {
    %c0_i32 = arith.constant 0 : i32
    %c0_i32_0 = arith.constant 0 : i32
    %c0_i32_1 = arith.constant 0 : i32
    return %c0_i32, %c0_i32_0 : i32, i32
  }
  func.func @transform_9(%arg0: i32) -> (i32, i32) {
    %c0_i32 = arith.constant 0 : i32
    %c0_i32_0 = arith.constant 0 : i32
    %c0_i32_1 = arith.constant 0 : i32
    return %c0_i32, %c0_i32_0 : i32, i32
  }
  func.func @transform_10(%arg0: i32) -> i32 {
    %c0_i32 = arith.constant 0 : i32
    %c0_i32_0 = arith.constant 0 : i32
    return %c0_i32 : i32
  }
  func.func @transform_11(%arg0: i32) -> (i32, i32) {
    %c0_i32 = arith.constant 0 : i32
    %c0_i32_0 = arith.constant 0 : i32
    return %arg0, %c0_i32 : i32, i32
  }
}

</mosaic_0001>

<bundles_post_ra>
// kernel: discriminator_forward.1
= control target key start
LH: loop header
LB: loop body
LE: loop exit
PB: predicated region body
PF: predicated region fallthrough
CT: control target
= control target key end

     0   :  { %vm976_vm2 = vmmov 0   ;;  %vm554_vm5 = vcmask 523264   ;;  %vm639_vm7 = vcmask 261120   ;;  %vm646_vm8 = vcmask 7168   ;;  %s1637_s1 = inlined_call_operand.vmem [shape: f32[512,256], index: 1, kind: input, shape index: {}]   ;;  %s1638_s0 = inlined_call_operand.vmem [shape: f32[8,512], index: 0, kind: input, shape index: {}]   ;;  %s1639_s3 = inlined_call_operand.vmem [shape: f32[256,128], index: 3, kind: input, shape index: {}]   ;;  %s1640_s2 = inlined_call_operand.vmem [shape: f32[1,256], index: 2, kind: input, shape index: {}]   ;;  %s1641_s5 = inlined_call_operand.vmem [shape: f32[128,64], index: 5, kind: input, shape index: {}]   ;;  %s1642_s4 = inlined_call_operand.vmem [shape: f32[1,128], index: 4, kind: input, shape index: {}]   ;;  %s1643_s7 = inlined_call_operand.vmem [shape: f32[64,32], index: 7, kind: input, shape index: {}]   ;;  %s1644_s6 = inlined_call_operand.vmem [shape: f32[1,64], index: 6, kind: input, shape index: {}]   ;;  %s1645_s8 = inlined_call_operand.vmem [shape: f32[1,32], index: 8, kind: input, shape index: {}]   ;;  %s1646_s9 = inlined_call_operand.vmem [shape: f32[1,32], index: 9, kind: input, shape index: {}]   ;;  %s1647_s10 = inlined_call_operand.<no memory space> [shape: f32[1], index: 10, kind: input, shape index: {}]   ;;  %s1648_s11 = inlined_call_operand.vmem [shape: f32[8,1], index: 11, kind: output, shape index: {}]  }
   0x1   :  { %v44_v0 = vld [vmem:[%s1637_s1 + $0x8] sm:$0xff]  ;;  %v46_v1 = vld [vmem:[%s1637_s1 + $0x18] sm:$0xff]  ;;  %v43_v2 = vld [vmem:[%s1637_s1] sm:$0xff] }
   0x2   :  { %v772_v3 = vpack.c.bf16 %v46_v1, %v44_v0  ;;  %v45_v4 = vld [vmem:[%s1637_s1 + $0x10] sm:$0xff]  ;;  %v48_v5 = vld [vmem:[%s1637_s1 + $0x28] sm:$0xff]  ;;  %v50_v6 = vld [vmem:[%s1637_s1 + $0x38] sm:$0xff] }
   0x3   :  { %v774_v7 = vpack.c.bf16 %v45_v4, %v43_v2  ;;  %v776_v8 = vpack.c.bf16 %v50_v6, %v48_v5  ;;  %v47_v9 = vld [vmem:[%s1637_s1 + $0x20] sm:$0xff]  ;;  %v49_v10 = vld [vmem:[%s1637_s1 + $0x30] sm:$0xff]  ;;  %v52_v11 = vld [vmem:[%s1637_s1 + $0x48] sm:$0xff] }
   0x4   :  { %773 = vmatprep.subr.bf16.mxu0 %v772_v3  ;;  %v54_v12 = vld [vmem:[%s1637_s1 + $0x58] sm:$0xff]  ;;  %v778_v13 = vpack.c.bf16 %v49_v10, %v47_v9  ;;  %v51_v15 = vld [vmem:[%s1637_s1 + $0x40] sm:$0xff]  ;;  %v53_v16 = vld [vmem:[%s1637_s1 + $0x50] sm:$0xff] }
   0x5   :  { %775 = vmatpush1.bf16.msra.mxu0 %v774_v7  ;;  %v780_v14 = vpack.c.bf16 %v54_v12, %v52_v11  ;;  %v56_v17 = vld [vmem:[%s1637_s1 + $0x68] sm:$0xff]  ;;  %v58_v18 = vld [vmem:[%s1637_s1 + $0x78] sm:$0xff]  ;;  %v782_v19 = vpack.c.bf16 %v53_v16, %v51_v15  ;;  %v55_v21 = vld [vmem:[%s1637_s1 + $0x60] sm:$0xff] }
   0x6   :  { %777 = vmatprep.subr.bf16.mxu0 %v776_v8  ;;  %v784_v20 = vpack.c.bf16 %v58_v18, %v56_v17  ;;  %v57_v22 = vld [vmem:[%s1637_s1 + $0x70] sm:$0xff]  ;;  %v60_v23 = vld [vmem:[%s1637_s1 + $0x88] sm:$0xff]  ;;  %v62_v24 = vld [vmem:[%s1637_s1 + $0x98] sm:$0xff] }
   0x7   :  { %v786_v25 = vpack.c.bf16 %v57_v22, %v55_v21  ;;  %v788_v26 = vpack.c.bf16 %v62_v24, %v60_v23  ;;  %v59_v27 = vld [vmem:[%s1637_s1 + $0x80] sm:$0xff]  ;;  %v61_v28 = vld [vmem:[%s1637_s1 + $0x90] sm:$0xff]  ;;  %v64_v29 = vld [vmem:[%s1637_s1 + $0xa8] sm:$0xff] }
   0x8   :  { %v66_v30 = vld [vmem:[%s1637_s1 + $0xb8] sm:$0xff]  ;;  %v790_v31 = vpack.c.bf16 %v61_v28, %v59_v27  ;;  %v63_v33 = vld [vmem:[%s1637_s1 + $0xa0] sm:$0xff]  ;;  %v65_v34 = vld [vmem:[%s1637_s1 + $0xb0] sm:$0xff] }
   0x9   :  { %779 = vmatpush1.bf16.msra.mxu0 %v778_v13  ;;  %v792_v32 = vpack.c.bf16 %v66_v30, %v64_v29  ;;  %v68_v35 = vld [vmem:[%s1637_s1 + $0xc8] sm:$0xff]  ;;  %v70_v36 = vld [vmem:[%s1637_s1 + $0xd8] sm:$0xff]  ;;  %v794_v37 = vpack.c.bf16 %v65_v34, %v63_v33  ;;  %v67_v39 = vld [vmem:[%s1637_s1 + $0xc0] sm:$0xff] }
   0xa   :  { %781 = vmatprep.subr.bf16.mxu0 %v780_v14  ;;  %v796_v38 = vpack.c.bf16 %v70_v36, %v68_v35  ;;  %v69_v40 = vld [vmem:[%s1637_s1 + $0xd0] sm:$0xff]  ;;  %v40_v41 = vld [vmem:[%s1638_s0 + $0x8] sm:$0xff]  ;;  %v74_v43 = vld [vmem:[%s1637_s1 + $0xf8] sm:$0xff] }
   0xb   :  { %v72_v42 = vld [vmem:[%s1637_s1 + $0xe8] sm:$0xff]  ;;  %247 = vmatprep.mubr.f32.mxu0 %v40_v41  ;;  %v798_v44 = vpack.c.bf16 %v69_v40, %v67_v39  ;;  %v71_v46 = vld [vmem:[%s1637_s1 + $0xe0] sm:$0xff]  ;;  %v73_v47 = vld [vmem:[%s1637_s1 + $0xf0] sm:$0xff] }
   0xc   :  { %v800_v45 = vpack.c.bf16 %v74_v43, %v72_v42  ;;  %v76_v48 = vld [vmem:[%s1637_s1 + $0x108] sm:$0xff]  ;;  %v78_v49 = vld [vmem:[%s1637_s1 + $0x118] sm:$0xff]  ;;  %v802_v50 = vpack.c.bf16 %v73_v47, %v71_v46  ;;  %v75_v52 = vld [vmem:[%s1637_s1 + $0x100] sm:$0xff] }
   0xd   :  { %783 = vmatpush1.bf16.msra.mxu0 %v782_v19  ;;  %v804_v51 = vpack.c.bf16 %v78_v49, %v76_v48  ;;  %v77_v53 = vld [vmem:[%s1637_s1 + $0x110] sm:$0xff]  ;;  %v80_v54 = vld [vmem:[%s1637_s1 + $0x128] sm:$0xff]  ;;  %v82_v55 = vld [vmem:[%s1637_s1 + $0x138] sm:$0xff] }
   0xe   :  { %785 = vmatprep.subr.bf16.mxu0 %v784_v20  ;;  %v806_v56 = vpack.c.bf16 %v77_v53, %v75_v52  ;;  %v808_v57 = vpack.c.bf16 %v82_v55, %v80_v54  ;;  %v79_v58 = vld [vmem:[%s1637_s1 + $0x120] sm:$0xff]  ;;  %v81_v59 = vld [vmem:[%s1637_s1 + $0x130] sm:$0xff]  ;;  %v84_v60 = vld [vmem:[%s1637_s1 + $0x148] sm:$0xff] }
   0xf   :  { %v86_v61 = vld [vmem:[%s1637_s1 + $0x158] sm:$0xff]  ;;  %v810_v62 = vpack.c.bf16 %v81_v59, %v79_v58  ;;  %v83_v0 = vld [vmem:[%s1637_s1 + $0x140] sm:$0xff]  ;;  %v85_v1 = vld [vmem:[%s1637_s1 + $0x150] sm:$0xff] }
  0x10   :  { %v812_v63 = vpack.c.bf16 %v86_v61, %v84_v60  ;;  %v88_v2 = vld [vmem:[%s1637_s1 + $0x168] sm:$0xff]  ;;  %v90_v3 = vld [vmem:[%s1637_s1 + $0x178] sm:$0xff]  ;;  %v814_v4 = vpack.c.bf16 %v85_v1, %v83_v0  ;;  %v87_v6 = vld [vmem:[%s1637_s1 + $0x160] sm:$0xff] }
  0x11   :  { %787 = vmatpush1.bf16.msra.mxu0 %v786_v25  ;;  %v816_v5 = vpack.c.bf16 %v90_v3, %v88_v2  ;;  %v89_v7 = vld [vmem:[%s1637_s1 + $0x170] sm:$0xff]  ;;  %v92_v8 = vld [vmem:[%s1637_s1 + $0x188] sm:$0xff]  ;;  %v94_v9 = vld [vmem:[%s1637_s1 + $0x198] sm:$0xff] }
  0x12   :  { %789 = vmatprep.subr.bf16.mxu0 %v788_v26  ;;  %v91_v10 = vld [vmem:[%s1637_s1 + $0x180] sm:$0xff]  ;;  %v93_v11 = vld [vmem:[%s1637_s1 + $0x190] sm:$0xff]  ;;  %v818_v12 = vpack.c.bf16 %v89_v7, %v87_v6  ;;  %v96_v13 = vld [vmem:[%s1637_s1 + $0x1a8] sm:$0xff]  ;;  %v820_v18 = vpack.c.bf16 %v94_v9, %v92_v8 }
  0x13   :  { %v98_v14 = vld [vmem:[%s1637_s1 + $0x1b8] sm:$0xff]  ;;  %v347_v15 = vld [vmem:[%s1639_s3 + $0x80] sm:$0xff]  ;;  %v348_v16 = vld [vmem:[%s1639_s3 + $0x88] sm:$0xff]  ;;  %v822_v29 = vpack.c.bf16 %v93_v11, %v91_v10 }
  0x14   :  { %v331_v17 = vld [vmem:[%s1639_s3] sm:$0xff]  ;;  %v900_v19 = vpack.c.bf16 %v348_v16, %v347_v15  ;;  %v332_v20 = vld [vmem:[%s1639_s3 + $0x8] sm:$0xff]  ;;  %v349_v21 = vld [vmem:[%s1639_s3 + $0x90] sm:$0xff]  ;;  %v824_v33 = vpack.c.bf16 %v98_v14, %v96_v13 }
  0x15   :  { %791 = vmatpush1.bf16.msra.mxu0 %v790_v31  ;;  %v350_v22 = vld [vmem:[%s1639_s3 + $0x98] sm:$0xff]  ;;  %v902_v23 = vpack.c.bf16 %v332_v20, %v331_v17  ;;  %v333_v25 = vld [vmem:[%s1639_s3 + $0x10] sm:$0xff]  ;;  %v351_v27 = vld [vmem:[%s1639_s3 + $0xa0] sm:$0xff] }
  0x16   :  { %793 = vmatprep.subr.bf16.mxu0 %v792_v32  ;;  %v904_v24 = vpack.c.bf16 %v350_v22, %v349_v21  ;;  %v334_v26 = vld [vmem:[%s1639_s3 + $0x18] sm:$0xff]  ;;  %901 = vmatprep.subr.bf16.mxu1 %v900_v19  ;;  %v352_v28 = vld [vmem:[%s1639_s3 + $0xa8] sm:$0xff]  ;;  %v95_v30 = vld [vmem:[%s1637_s1 + $0x1a0] sm:$0xff] }
  0x17   :  { %v97_v31 = vld [vmem:[%s1637_s1 + $0x1b0] sm:$0xff]  ;;  %903 = vmatpush3.bf16.msra.mxu1 %v902_v23  ;;  %v906_v32 = vpack.c.bf16 %v334_v26, %v333_v25  ;;  %v100_v34 = vld [vmem:[%s1637_s1 + $0x1c8] sm:$0xff]  ;;  %v908_v35 = vpack.c.bf16 %v352_v28, %v351_v27  ;;  %v335_v36 = vld [vmem:[%s1639_s3 + $0x20] sm:$0xff] }
  0x18   :  { %905 = vmatprep.subr.bf16.mxu1 %v904_v24  ;;  %v353_v39 = vld [vmem:[%s1639_s3 + $0xb0] sm:$0xff]  ;;  %v354_v40 = vld [vmem:[%s1639_s3 + $0xb8] sm:$0xff]  ;;  %v826_v41 = vpack.c.bf16 %v97_v31, %v95_v30  ;;  %v99_v42 = vld [vmem:[%s1637_s1 + $0x1c0] sm:$0xff] }
  0x19   :  { %795 = vmatpush1.bf16.msra.mxu0 %v794_v37  ;;  %v336_v37 = vld [vmem:[%s1639_s3 + $0x28] sm:$0xff]  ;;  %v101_v43 = vld [vmem:[%s1637_s1 + $0x1d0] sm:$0xff]  ;;  %v912_v47 = vpack.c.bf16 %v354_v40, %v353_v39  ;;  %v338_v49 = vld [vmem:[%s1639_s3 + $0x38] sm:$0xff] }
  0x1a   :  { %797 = vmatprep.subr.bf16.mxu0 %v796_v38  ;;  %v102_v38 = vld [vmem:[%s1637_s1 + $0x1d8] sm:$0xff]  ;;  %v104_v46 = vld [vmem:[%s1637_s1 + $0x1e8] sm:$0xff]  ;;  %v337_v48 = vld [vmem:[%s1639_s3 + $0x30] sm:$0xff]  ;;  %v830_v53 = vpack.c.bf16 %v101_v43, %v99_v42 }
  0x1b   :  { %907 = vmatpush3.bf16.msra.mxu1 %v906_v32  ;;  %v356_v52 = vld [vmem:[%s1639_s3 + $0xc8] sm:$0xff]  ;;  %v103_v54 = vld [vmem:[%s1637_s1 + $0x1e0] sm:$0xff]  ;;  %v105_v55 = vld [vmem:[%s1637_s1 + $0x1f0] sm:$0xff] }
  0x1c   :  { %909 = vmatprep.subr.bf16.mxu1 %v908_v35  ;;  %v108_v58 = vld [vmem:[%s1637_s1 + $0x208] sm:$0xff]  ;;  %v339_v60 = vld [vmem:[%s1639_s3 + $0x40] sm:$0xff]  ;;  %v358_v0 = vld [vmem:[%s1639_s3 + $0xd8] sm:$0xff]  ;;  %v834_v1 = vpack.c.bf16 %v105_v55, %v103_v54 }
  0x1d   :  { %799 = vmatpush1.bf16.msra.mxu0 %v798_v44  ;;  %v910_v44 = vpack.c.bf16 %v336_v37, %v335_v36  ;;  %v340_v61 = vld [vmem:[%s1639_s3 + $0x48] sm:$0xff]  ;;  %v114_v8 = vld [vmem:[%s1637_s1 + $0x238] sm:$0xff]  ;;  %v341_v9 = vld [vmem:[%s1639_s3 + $0x50] sm:$0xff] }
  0x1e   :  { %801 = vmatprep.subr.bf16.mxu0 %v800_v45  ;;  %v828_v45 = vpack.c.bf16 %v102_v38, %v100_v34  ;;  %v918_v2 = vpack.c.bf16 %v340_v61, %v339_v60  ;;  %v112_v6 = vld [vmem:[%s1637_s1 + $0x228] sm:$0xff]  ;;  %v342_v10 = vld [vmem:[%s1639_s3 + $0x58] sm:$0xff]  ;;  %v39_v11 = vld [vmem:[%s1638_s0] sm:$0xff] }
  0x1f   :  { %911 = vmatpush3.bf16.msra.mxu1 %v910_v44  ;;  %v840_v13 = vpack.c.bf16 %v114_v8, %v112_v6  ;;  %v111_v14 = vld [vmem:[%s1637_s1 + $0x220] sm:$0xff]  ;;  %v113_v15 = vld [vmem:[%s1637_s1 + $0x230] sm:$0xff]  ;;  %v42_v16 = vld [vmem:[%s1638_s0 + $0x18] sm:$0xff]  ;;  %v922_v17 = vpack.c.bf16 %v342_v10, %v341_v9 }
  0x20   :  { %913 = vmatprep.subr.bf16.mxu1 %v912_v47  ;;  %v118_v19 = vld [vmem:[%s1637_s1 + $0x258] sm:$0xff]  ;;  %v842_v20 = vpack.c.bf16 %v113_v15, %v111_v14  ;;  %v115_v22 = vld [vmem:[%s1637_s1 + $0x240] sm:$0xff]  ;;  %v117_v23 = vld [vmem:[%s1637_s1 + $0x250] sm:$0xff] }
  0x21   :  { %803 = vmatpush1.bf16.msra.mxu0 %v802_v50  ;;  %v106_v50 = vld [vmem:[%s1637_s1 + $0x1f8] sm:$0xff]  ;;  %v120_v24 = vld [vmem:[%s1637_s1 + $0x268] sm:$0xff]  ;;  %v846_v26 = vpack.c.bf16 %v117_v23, %v115_v22  ;;  %v119_v28 = vld [vmem:[%s1637_s1 + $0x260] sm:$0xff] }
  0x22   :  { %805 = vmatprep.subr.bf16.mxu0 %v804_v51  ;;  %v355_v51 = vld [vmem:[%s1639_s3 + $0xc0] sm:$0xff]  ;;  %v122_v25 = vld [vmem:[%s1637_s1 + $0x278] sm:$0xff]  ;;  %v124_v30 = vld [vmem:[%s1637_s1 + $0x288] sm:$0xff] }
  0x23   :  { %v916_v59 = vpack.c.bf16 %v356_v52, %v355_v51  ;;  %v848_v27 = vpack.c.bf16 %v122_v25, %v120_v24  ;;  %v126_v31 = vld [vmem:[%s1637_s1 + $0x298] sm:$0xff]  ;;  %v123_v34 = vld [vmem:[%s1637_s1 + $0x280] sm:$0xff]  ;;  %v125_v35 = vld [vmem:[%s1637_s1 + $0x290] sm:$0xff] }
  0x24   :  { %v128_v36 = vld [vmem:[%s1637_s1 + $0x2a8] sm:$0xff]  ;;  %v130_v37 = vld [vmem:[%s1637_s1 + $0x2b8] sm:$0xff]  ;;  %v854_v38 = vpack.c.bf16 %v125_v35, %v123_v34  ;;  %v127_v40 = vld [vmem:[%s1637_s1 + $0x2a0] sm:$0xff] }
  0x25   :  { %807 = vmatpush1.bf16.msra.mxu0 %v806_v56  ;;  %v914_v56 = vpack.c.bf16 %v338_v49, %v337_v48  ;;  %v856_v39 = vpack.c.bf16 %v130_v37, %v128_v36  ;;  %v132_v42 = vld [vmem:[%s1637_s1 + $0x2c8] sm:$0xff]  ;;  %v134_v43 = vld [vmem:[%s1637_s1 + $0x2d8] sm:$0xff]  ;;  %v133_v47 = vld [vmem:[%s1637_s1 + $0x2d0] sm:$0xff] }
  0x26   :  { %809 = vmatprep.subr.bf16.mxu0 %v808_v57  ;;  %v832_v57 = vpack.c.bf16 %v106_v50, %v104_v46  ;;  %v131_v46 = vld [vmem:[%s1637_s1 + $0x2c0] sm:$0xff]  ;;  %v136_v48 = vld [vmem:[%s1637_s1 + $0x2e8] sm:$0xff]  ;;  %v138_v49 = vld [vmem:[%s1637_s1 + $0x2f8] sm:$0xff] }
  0x27   :  { %915 = vmatpush3.bf16.msra.mxu1 %v914_v56  ;;  %v862_v50 = vpack.c.bf16 %v133_v47, %v131_v46  ;;  %v864_v51 = vpack.c.bf16 %v138_v49, %v136_v48  ;;  %v135_v52 = vld [vmem:[%s1637_s1 + $0x2e0] sm:$0xff]  ;;  %v140_v54 = vld [vmem:[%s1637_s1 + $0x308] sm:$0xff]  ;;  %v142_v55 = vld [vmem:[%s1637_s1 + $0x318] sm:$0xff] }
  0x28   :  { %917 = vmatprep.subr.bf16.mxu1 %v916_v59  ;;  %v141_v59 = vld [vmem:[%s1637_s1 + $0x310] sm:$0xff]  ;;  %v144_v60 = vld [vmem:[%s1637_s1 + $0x328] sm:$0xff]  ;;  %v146_v61 = vld [vmem:[%s1637_s1 + $0x338] sm:$0xff] }
  0x29   :  { %811 = vmatpush1.bf16.msra.mxu0 %v810_v62  ;;  %v110_v62 = vld [vmem:[%s1637_s1 + $0x218] sm:$0xff]  ;;  %v147_v6 = vld [vmem:[%s1637_s1 + $0x340] sm:$0xff]  ;;  %v152_v8 = vld [vmem:[%s1637_s1 + $0x368] sm:$0xff] }
  0x2a   :  { %813 = vmatprep.subr.bf16.mxu0 %v812_v63  ;;  %v357_v63 = vld [vmem:[%s1639_s3 + $0xd0] sm:$0xff]  ;;  %v836_v3 = vpack.c.bf16 %v110_v62, %v108_v58  ;;  %v139_v58 = vld [vmem:[%s1637_s1 + $0x300] sm:$0xff]  ;;  %v154_v9 = vld [vmem:[%s1637_s1 + $0x378] sm:$0xff] }
  0x2b   :  { %v920_v7 = vpack.c.bf16 %v358_v0, %v357_v63  ;;  %919 = vmatpush3.bf16.msra.mxu1 %v918_v2  ;;  %v870_v62 = vpack.c.bf16 %v141_v59, %v139_v58  ;;  %v872_v63 = vpack.c.bf16 %v146_v61, %v144_v60  ;;  %v143_v0 = vld [vmem:[%s1637_s1 + $0x320] sm:$0xff]  ;;  %v148_v2 = vld [vmem:[%s1637_s1 + $0x348] sm:$0xff]  ;;  %v158_v15 = vld [vmem:[%s1637_s1 + $0x398] sm:$0xff] }
  0x2c   :  { %v156_v14 = vld [vmem:[%s1637_s1 + $0x388] sm:$0xff]  ;;  %v159_v24 = vld [vmem:[%s1637_s1 + $0x3a0] sm:$0xff]  ;;  %v161_v25 = vld [vmem:[%s1637_s1 + $0x3b0] sm:$0xff] }
  0x2d   :  { %815 = vmatpush1.bf16.msra.mxu0 %v814_v4  ;;  %v107_v4 = vld [vmem:[%s1637_s1 + $0x200] sm:$0xff]  ;;  %921 = vmatprep.subr.bf16.mxu1 %v920_v7  ;;  %v149_v7 = vld [vmem:[%s1637_s1 + $0x350] sm:$0xff]  ;;  %v362_v47 = vld [vmem:[%s1639_s3 + $0xf8] sm:$0xff] }
  0x2e   :  { %817 = vmatprep.subr.bf16.mxu0 %v816_v5  ;;  %v109_v5 = vld [vmem:[%s1637_s1 + $0x210] sm:$0xff]  ;;  %v878_v10 = vpack.c.bf16 %v149_v7, %v147_v6  ;;  %v167_v36 = vld [vmem:[%s1637_s1 + $0x3e0] sm:$0xff]  ;;  %v446_v7 = vld [vmem:[%s1641_s5 + $0x18] sm:$0xff] }
  0x2f   :  { %923 = vmatpush3.bf16.msra.mxu1 %v922_v17  ;;  %v884_v17 = vpack.c.bf16 %v158_v15, %v156_v14  ;;  %v169_v37 = vld [vmem:[%s1637_s1 + $0x3f0] sm:$0xff]  ;;  %v450_v14 = vld [vmem:[%s1641_s5 + $0x38] sm:$0xff] }
  0x30   :  { %v361_v46 = vld [vmem:[%s1639_s3 + $0xf0] sm:$0xff] }
  0x31   :  { %819 = vmatpush1.bf16.msra.mxu0 %v818_v12  ;;  %v838_v12 = vpack.c.bf16 %v109_v5, %v107_v4  ;;  %v928_v48 = vpack.c.bf16 %v362_v47, %v361_v46  ;;  %v345_v49 = vld [vmem:[%s1639_s3 + $0x70] sm:$0xff]  ;;  %v546_v46 = vld [vmem:[%s1643_s7 + $0x38] sm:$0xff] }
  0x32   :  { %821 = vmatprep.subr.bf16.mxu0 %v820_v18  ;;  %v116_v18 = vld [vmem:[%s1637_s1 + $0x248] sm:$0xff]  ;;  %v445_v6 = vld [vmem:[%s1641_s5 + $0x10] sm:$0xff] }
  0x33   :  { %v844_v21 = vpack.c.bf16 %v118_v19, %v116_v18  ;;  %v155_v18 = vld [vmem:[%s1637_s1 + $0x380] sm:$0xff]  ;;  %v157_v19 = vld [vmem:[%s1637_s1 + $0x390] sm:$0xff] }
  0x34   :  { %v886_v22 = vpack.c.bf16 %v157_v19, %v155_v18  ;;  %v453_v19 = vld [vmem:[%s1641_s5 + $0x50] sm:$0xff] }
  0x35   :  { %823 = vmatpush1.bf16.msra.mxu0 %v822_v29  ;;  %v121_v29 = vld [vmem:[%s1637_s1 + $0x270] sm:$0xff] }
  0x36   :  { %825 = vmatprep.subr.bf16.mxu0 %v824_v33  ;;  %v850_v32 = vpack.c.bf16 %v121_v29, %v119_v28  ;;  %v852_v33 = vpack.c.bf16 %v126_v31, %v124_v30  ;;  %v890_v28 = vpack.c.bf16 %v161_v25, %v159_v24  ;;  %v163_v30 = vld [vmem:[%s1637_s1 + $0x3c0] sm:$0xff]  ;;  %v165_v31 = vld [vmem:[%s1637_s1 + $0x3d0] sm:$0xff] }
  0x37   :  { %v894_v34 = vpack.c.bf16 %v165_v31, %v163_v30  ;;  %v457_v25 = vld [vmem:[%s1641_s5 + $0x70] sm:$0xff]  ;;  %v652_v30 = vld [vmem:[%s1642_s4] ss:$0 sm:$0xff] }
  0x39   :  { %827 = vmatpush1.bf16.msra.mxu0 %v826_v41  ;;  %v129_v41 = vld [vmem:[%s1637_s1 + $0x2b0] sm:$0xff] }
  0x3a   :  { %829 = vmatprep.subr.bf16.mxu0 %v828_v45  ;;  %v858_v44 = vpack.c.bf16 %v129_v41, %v127_v40  ;;  %v860_v45 = vpack.c.bf16 %v134_v43, %v132_v42  ;;  %v359_v40 = vld [vmem:[%s1639_s3 + $0xe0] sm:$0xff]  ;;  %v360_v41 = vld [vmem:[%s1639_s3 + $0xe8] sm:$0xff] }
  0x3b   :  { %v924_v42 = vpack.c.bf16 %v360_v41, %v359_v40  ;;  %v343_v43 = vld [vmem:[%s1639_s3 + $0x60] sm:$0xff] }
  0x3d   :  { %831 = vmatpush1.bf16.msra.mxu0 %v830_v53  ;;  %v137_v53 = vld [vmem:[%s1637_s1 + $0x2f0] sm:$0xff]  ;;  %925 = vmatprep.subr.bf16.mxu1 %v924_v42  ;;  %v543_v42 = vld [vmem:[%s1643_s7 + $0x20] sm:$0xff] }
  0x3e   :  { %833 = vmatprep.subr.bf16.mxu0 %v832_v57  ;;  %v866_v56 = vpack.c.bf16 %v137_v53, %v135_v52  ;;  %v868_v57 = vpack.c.bf16 %v142_v55, %v140_v54  ;;  %v975_v52 = vmov 0.0|0.0   ;;  %v173_v53 = vlaneseq }
  0x40   :  { %v174_v54 = vshrl.u32 %v173_v53, 7 }
  0x41   :  { %835 = vmatpush1.bf16.msra.mxu0 %v834_v1  ;;  %v145_v1 = vld [vmem:[%s1637_s1 + $0x330] sm:$0xff] }
  0x42   :  { %837 = vmatprep.subr.bf16.mxu0 %v836_v3  ;;  %v150_v3 = vld [vmem:[%s1637_s1 + $0x358] sm:$0xff]  ;;  %v874_v4 = vpack.c.bf16 %v145_v1, %v143_v0  ;;  %v175_v55 = vsub.s32 0, %v174_v54  ;;  %v443_v0 = vld [vmem:[%s1641_s5] sm:$0xff]  ;;  %v444_v1 = vld [vmem:[%s1641_s5 + $0x8] sm:$0xff] }
  0x43   :  { %v876_v5 = vpack.c.bf16 %v150_v3, %v148_v2 }
  0x44   :  { %248 = vmatmul.mubr.f32.vlgmr.msra.gmra.mrb[0].mxu0 %v39_v11  ;;  %v880_v11 = vpack.c.bf16 %v154_v9, %v152_v8  ;;  %v936_v9 = vpack.c.bf16 %v446_v7, %v445_v6 }
  0x45   :  { %839 = vmatpush1.bf16.msra.mxu0 %v838_v12  ;;  %318 = vmatprep.mubr.f32.mxu0 %v42_v16  ;;  %v151_v12 = vld [vmem:[%s1637_s1 + $0x360] sm:$0xff] }
  0x46   :  { %841 = vmatprep.subr.bf16.mxu0 %v840_v13  ;;  %v153_v13 = vld [vmem:[%s1637_s1 + $0x370] sm:$0xff] }
  0x47   :  { %v882_v16 = vpack.c.bf16 %v153_v13, %v151_v12  ;;  %v449_v13 = vld [vmem:[%s1641_s5 + $0x30] sm:$0xff] }
  0x48   :  { %v942_v15 = vpack.c.bf16 %v450_v14, %v449_v13 }
  0x49   :  { %843 = vmatpush1.bf16.msra.mxu0 %v842_v20  ;;  %v160_v20 = vld [vmem:[%s1637_s1 + $0x3a8] sm:$0xff] }
  0x4a   :  { %845 = vmatprep.subr.bf16.mxu0 %v844_v21  ;;  %v162_v21 = vld [vmem:[%s1637_s1 + $0x3b8] sm:$0xff] }
  0x4b   :  { %v888_v23 = vpack.c.bf16 %v162_v21, %v160_v20  ;;  %v454_v20 = vld [vmem:[%s1641_s5 + $0x58] sm:$0xff] }
  0x4c   :  { %v948_v21 = vpack.c.bf16 %v454_v20, %v453_v19 }
  0x4d   :  { %847 = vmatpush1.bf16.msra.mxu0 %v846_v26  ;;  %v164_v26 = vld [vmem:[%s1637_s1 + $0x3c8] sm:$0xff] }
  0x4e   :  { %849 = vmatprep.subr.bf16.mxu0 %v848_v27  ;;  %v166_v27 = vld [vmem:[%s1637_s1 + $0x3d8] sm:$0xff] }
  0x4f   :  { %v892_v29 = vpack.c.bf16 %v166_v27, %v164_v26  ;;  %v458_v26 = vld [vmem:[%s1641_s5 + $0x78] sm:$0xff] }
  0x50   :  { %v954_v27 = vpack.c.bf16 %v458_v26, %v457_v25 }
  0x51   :  { %851 = vmatpush1.bf16.msra.mxu0 %v850_v32  ;;  %v168_v32 = vld [vmem:[%s1637_s1 + $0x3e8] sm:$0xff] }
  0x52   :  { %853 = vmatprep.subr.bf16.mxu0 %v852_v33  ;;  %v170_v33 = vld [vmem:[%s1637_s1 + $0x3f8] sm:$0xff] }
  0x53   :  { %v896_v35 = vpack.c.bf16 %v170_v33, %v168_v32  ;;  %v539_v33 = vld [vmem:[%s1643_s7] sm:$0xff] }
  0x55   :  { %855 = vmatpush1.bf16.msra.mxu0 %v854_v38  ;;  %v898_v38 = vpack.c.bf16 %v169_v37, %v167_v36 }
  0x56   :  { %857 = vmatprep.subr.bf16.mxu0 %v856_v39  ;;  %v41_v39 = vld [vmem:[%s1638_s0 + $0x10] sm:$0xff] }
  0x59   :  { %859 = vmatpush1.bf16.msra.mxu0 %v858_v44  ;;  %v344_v44 = vld [vmem:[%s1639_s3 + $0x68] sm:$0xff] }
  0x5a   :  { %861 = vmatprep.subr.bf16.mxu0 %v860_v45  ;;  %v926_v45 = vpack.c.bf16 %v344_v44, %v343_v43  ;;  %v544_v43 = vld [vmem:[%s1643_s7 + $0x28] sm:$0xff] }
  0x5b   :  { %v963_v44 = vpack.c.bf16 %v544_v43, %v543_v42 }
  0x5c   :  { %927 = vmatpush3.bf16.msra.mxu1 %v926_v45  ;;  %v545_v45 = vld [vmem:[%s1643_s7 + $0x30] sm:$0xff] }
  0x5d   :  { %863 = vmatpush1.bf16.msra.mxu0 %v862_v50  ;;  %v346_v50 = vld [vmem:[%s1639_s3 + $0x78] sm:$0xff]  ;;  %929 = vmatprep.subr.bf16.mxu1 %v928_v48  ;;  %v966_v47 = vpack.c.bf16 %v546_v46, %v545_v45  ;;  %v653_v48 = vld [vmem:[%s1644_s6] ss:$0 sm:$0xff] }
  0x5e   :  { %865 = vmatprep.subr.bf16.mxu0 %v864_v51  ;;  %v930_v51 = vpack.c.bf16 %v346_v50, %v345_v49 }
  0x60   :  { %931 = vmatpush3.bf16.msra.mxu1 %v930_v51 }
  0x61   :  { %867 = vmatpush1.bf16.msra.mxu0 %v866_v56  ;;  %932 = vmatprep.subr.bf16.mxu1 %v975_v52  ;;  %v171_v56 = vld [vmem:[%s1640_s2] sm:$0x3] }
  0x62   :  { %869 = vmatprep.subr.bf16.mxu0 %v868_v57  ;;  %v179_v57 = vsub.s32 1, %v174_v54  ;;  %v176_v58 = vrot.slane %v171_v56, %v175_v55  ;;  %v654_v54 = vld [vmem:[%s1645_s8] ss:$0 sm:$0xff] }
  0x64   :  { %v180_v59 = vrot.slane %v171_v56, %v179_v57 }
  0x65   :  { %871 = vmatpush1.bf16.msra.mxu0 %v870_v62 }
  0x66   :  { %873 = vmatprep.subr.bf16.mxu0 %v872_v63 }
  0x69   :  { %875 = vmatpush1.bf16.msra.mxu0 %v874_v4  ;;  %v933_v4 = vpack.c.bf16 %v444_v1, %v443_v0 }
  0x6a   :  { %877 = vmatprep.subr.bf16.mxu0 %v876_v5 }
  0x6d   :  { %879 = vmatpush1.bf16.msra.mxu0 %v878_v10  ;;  %v447_v10 = vld [vmem:[%s1641_s5 + $0x20] sm:$0xff] }
  0x6e   :  { %881 = vmatprep.subr.bf16.mxu0 %v880_v11  ;;  %v448_v11 = vld [vmem:[%s1641_s5 + $0x28] sm:$0xff] }
  0x6f   :  { %v939_v12 = vpack.c.bf16 %v448_v11, %v447_v10 }
  0x71   :  { %883 = vmatpush1.bf16.msra.mxu0 %v882_v16  ;;  %v451_v16 = vld [vmem:[%s1641_s5 + $0x40] sm:$0xff] }
  0x72   :  { %885 = vmatprep.subr.bf16.mxu0 %v884_v17  ;;  %v452_v17 = vld [vmem:[%s1641_s5 + $0x48] sm:$0xff] }
  0x73   :  { %v945_v18 = vpack.c.bf16 %v452_v17, %v451_v16 }
  0x75   :  { %887 = vmatpush1.bf16.msra.mxu0 %v886_v22  ;;  %v455_v22 = vld [vmem:[%s1641_s5 + $0x60] sm:$0xff] }
  0x76   :  { %889 = vmatprep.subr.bf16.mxu0 %v888_v23  ;;  %v456_v23 = vld [vmem:[%s1641_s5 + $0x68] sm:$0xff] }
  0x77   :  { %v951_v24 = vpack.c.bf16 %v456_v23, %v455_v22 }
  0x79   :  { %891 = vmatpush1.bf16.msra.mxu0 %v890_v28  ;;  %v977_v28 = vmov 0.0  }
  0x7a   :  { %893 = vmatprep.subr.bf16.mxu0 %v892_v29 }
  0x7d   :  { %895 = vmatpush1.bf16.msra.mxu0 %v894_v34  ;;  %v540_v34 = vld [vmem:[%s1643_s7 + $0x8] sm:$0xff] }
  0x7e   :  { %897 = vmatprep.subr.bf16.mxu0 %v896_v35  ;;  %v957_v37 = vpack.c.bf16 %v540_v34, %v539_v33 }
  0x81   :  { %899 = vmatpush1.bf16.msra.mxu0 %v898_v38  ;;  %v541_v38 = vld [vmem:[%s1643_s7 + $0x10] sm:$0xff] }
  0x84   :  { %319 = vmatmul.mubr.f32.vlgmr.msra.gmra.mrb[0].mxu0 %v41_v39  ;;  %v542_v39 = vld [vmem:[%s1643_s7 + $0x18] sm:$0xff] }
  0x85   :  { %v960_v41 = vpack.c.bf16 %v542_v39, %v541_v38 }
 0x157   :  { %v320_v60 = vpop.f32.mrb[0].mxu0 }
 0x158   :  { %v968_v61 = vadd.f32 %v320_v60, %v176_v58  ;;  %v322_v62 = vpop.f32.mrb[1].mxu0 }
 0x159   :  { %v969_v63 = vadd.f32 %v322_v62, %v180_v59  ;;  %v656_v59 = vld [vmem:[%s1646_s9] ss:$0 sm:$0xff] }
 0x15a   :  { %v327_v2 = vmul.f32 0.2, %v968_v61  ;;  %vm325_vm1 = vcmp.gt.f32.partialorder %v968_v61, 0.0 }
 0x15b   :  { %vm326_vm0 = vcmp.gt.f32.partialorder %v969_v63, 0.0  ;;  %v328_v3 = vmul.f32 0.2, %v969_v63 }
 0x15c   :  { %v329_v8 = vsel %vm325_vm1, %v968_v61, %v327_v2 }
 0x15d   :  { %v330_v5 = vsel %vm326_vm0, %v969_v63, %v328_v3  ;;  %v644_v63 = vstv %s1647_s10 }
 0x15e   :  { %434 = vmatprep.mubr.f32.mxu1 %v330_v5 }
 0x15f   :  { %435 = vmatmul.mubr.f32.vlgmr.msra.gmra.mrb[0].mxu1 %v329_v8 }
 0x160   :  { %934 = vmatpush3.bf16.msra.mxu1 %v933_v4  ;;  %750 = vmatprep.mubr.msk.f32.mxu1 %vm976_vm2, %v977_v28 }
 0x161   :  { %935 = vmatprep.subr.bf16.mxu1 %v975_v52 }
 0x164   :  { %937 = vmatpush3.bf16.msra.mxu1 %v936_v9 }
 0x165   :  { %938 = vmatprep.subr.bf16.mxu1 %v975_v52 }
 0x168   :  { %940 = vmatpush3.bf16.msra.mxu1 %v939_v12 }
 0x169   :  { %941 = vmatprep.subr.bf16.mxu1 %v975_v52 }
 0x16c   :  { %943 = vmatpush3.bf16.msra.mxu1 %v942_v15 }
 0x16d   :  { %944 = vmatprep.subr.bf16.mxu1 %v975_v52 }
 0x170   :  { %946 = vmatpush3.bf16.msra.mxu1 %v945_v18 }
 0x171   :  { %947 = vmatprep.subr.bf16.mxu1 %v975_v52 }
 0x174   :  { %949 = vmatpush3.bf16.msra.mxu1 %v948_v21 }
 0x175   :  { %950 = vmatprep.subr.bf16.mxu1 %v975_v52 }
 0x178   :  { %952 = vmatpush3.bf16.msra.mxu1 %v951_v24 }
 0x179   :  { %953 = vmatprep.subr.bf16.mxu1 %v975_v52 }
 0x17c   :  { %955 = vmatpush3.bf16.msra.mxu1 %v954_v27 }
 0x17d   :  { %956 = vmatprep.subr.bf16.mxu1 %v975_v52 }
 0x232   :  { %v689_v29 = vpop.f32.mrb[0].mxu1 }
 0x233   :  { %v690_v31 = vpop.f32.mrb[1].mxu1 }
 0x234   :  { %v691_v32 = vadd.f32 %v690_v31, %v689_v29 }
 0x236   :  { %v437_v35 = vadd.f32 %v691_v32, %v652_v30 }
 0x238   :  { %v441_v36 = vmul.f32 0.2, %v437_v35  ;;  %vm440_vm3 = vcmp.gt.f32.partialorder %v437_v35, 0.0 }
 0x23a   :  { %v442_v40 = vsel %vm440_vm3, %v437_v35, %v441_v36 }
 0x23b   :  { %751 = vmatmul.mubr.f32.vlgmr.msra.gmra.mrb[2].mxu1 %v442_v40 }
 0x23c   :  { %958 = vmatpush3.bf16.msra.mxu1 %v957_v37  ;;  %769 = vmatprep.mubr.msk.f32.mxu1 %vm976_vm2, %v977_v28 }
 0x23d   :  { %959 = vmatprep.subr.bf16.mxu1 %v975_v52 }
 0x240   :  { %961 = vmatpush3.bf16.msra.mxu1 %v960_v41 }
 0x241   :  { %962 = vmatprep.subr.bf16.mxu1 %v975_v52 }
 0x244   :  { %964 = vmatpush3.bf16.msra.mxu1 %v963_v44 }
 0x245   :  { %965 = vmatprep.subr.bf16.mxu1 %v975_v52 }
 0x248   :  { %967 = vmatpush3.bf16.msra.mxu1 %v966_v47 }
 0x30e   :  { %v532_v49 = vpop.f32.mrb[2].mxu1 }
 0x30f   :  { %v533_v50 = vadd.f32 %v653_v48, %v532_v49  ;;  %v752_v51 = vpop.f32.mrb[3].mxu1 }
 0x311   :  { %vm536_vm4 = vcmp.gt.f32.partialorder %v533_v50, 0.0  ;;  %v537_v53 = vmul.f32 0.2, %v533_v50 }
 0x313   :  { %v538_v52 = vsel %vm536_vm4, %v533_v50, %v537_v53 }
 0x314   :  { %770 = vmatmul.mubr.msk.f32.vlgmr.msra.gmra.mrb[4].mxu1 %vm554_vm5, %v538_v52 }
 0x3e7   :  { %v624_v55 = vpop.f32.mrb[4].mxu1 }
 0x3e8   :  { %v625_v56 = vadd.f32 %v654_v54, %v624_v55  ;;  %v771_v57 = vpop.f32.mrb[5].mxu1 }
 0x3ea   :  { %v629_v58 = vmul.f32 0.2, %v625_v56  ;;  %vm628_vm6 = vcmp.gt.f32.partialorder %v625_v56, 0.0 }
 0x3ec   :  { %v630_v60 = vsel %vm628_vm6, %v625_v56, %v629_v58 }
 0x3ed   :  { %v638_v61 = vmul.f32 %v656_v59, %v630_v60 }
 0x3ef   :  { %v640_v62 = vsel %vm639_vm7, %v638_v61, 0.0 }
 0x3f0   :  { %641 = vadd.xlane.f32.xlu0 %v640_v62 }
 0x47d   :  { %v642_v0 = vpop.xlane.xlu0 %641 }
 0x47e   :  { %v645_v1 = vadd.f32 %v644_v63, %v642_v0 }
 0x480   :  { %647 = vst.msk [vmem:[%s1648_s11] sm:$0xff] %vm646_vm8, %v645_v1 }

</bundles_post_ra>
